<compile_context>
chip_gen: v5e
topology: v5e:2x2
jax: 0.10.0
libtpu: 0.0.40
codegen_flags: <defaults>
</compile_context>

<pallas_src>
import jax
import jax.numpy as jnp
from jax.experimental import pallas as pl
from jax.experimental.pallas import tpu as pltpu


def _round_up(n, m):
    return ((n + m - 1) // m) * m


def _num_tensorcores():
    """Best-effort TensorCores-per-chip (2 on v7x, 1 on v5e/v6e)."""
    try:
        kind = jax.devices()[0].device_kind.lower()
    except Exception:
        return 1
    return 2 if "v7" in kind else 1


def _elu(h):
    # ELU, alpha=1.0 (PyTorch default).  The exp() of the (discarded) positive
    # branch can only produce +inf, never NaN, so the select is safe unclamped.
    return jnp.where(h > 0.0, h, jnp.exp(h) - 1.0)


def _make_decoder_kernel(tile, chunk):
    """Fused 5-layer MLP on one (L, tile) batch tile, batch on the lane axis.

    The tile is processed in `chunk`-lane sub-windows (static, 128-aligned
    starts) so the f32 intermediates stay ~16 vregs per layer while the grid
    tile stays big enough to amortize per-step DMA / loop overhead.
    """

    def kernel(x_ref,             # (L,  tile) bf16 — batch on lanes
               w1_ref, b1_ref,    # (H,  L) bf16, (H, 1) f32
               w2_ref, b2_ref,    # (H,  H) bf16, (H, 1) f32
               w3_ref, b3_ref,
               w4_ref, b4_ref,
               w5_ref, b5_ref,    # (H,  1) f32 column, (1, 1) f32
               o_ref):            # (1,  tile) f32 — lane-dense
        layers = ((w1_ref, b1_ref), (w2_ref, b2_ref),
                  (w3_ref, b3_ref), (w4_ref, b4_ref))

        def run_chunk(start, width):
            h = x_ref[:, pl.ds(start, width)]                     # bf16 (L, width)
            for i, (w_ref, b_ref) in enumerate(layers):
                a = jnp.dot(w_ref[...], h,
                            preferred_element_type=jnp.float32)   # MXU, f32 acc
                a = _elu(a + b_ref[...])                          # ELU in f32
                # bf16 operand for the next MXU dot; the 4th activation feeds
                # the VPU final layer, so keep it in f32 (no wasted cast).
                h = a.astype(jnp.bfloat16) if i < 3 else a
            # Final Linear(hidden, 1) off the MXU: broadcast-mul (VALU slot) +
            # axis-0 sublane reduce (XLU slot) — both have slack here, and it
            # avoids an MXU push that would use 1 of 128/256 output rows.
            out = jnp.sum(w5_ref[...] * h, axis=0, keepdims=True) + b5_ref[...]
            o_ref[:, pl.ds(start, width)] = out.astype(o_ref.dtype)

        # Static, 128-aligned chunk starts: every slice is a plain aligned
        # sub-window (no dynamic lane indexing), bounding live f32 ranges.
        for start in range(0, tile, chunk):
            run_chunk(start, min(chunk, tile - start))

    return kernel


def _decoder_forward_impl(x, params, batch_tile, lane_chunk):
    B, L = x.shape
    (w1, b1), (w2, b2), (w3, b3), (w4, b4), (w5, b5) = params

    # ---- batch tiling: lane-dense and TC-balanced ----
    lanes = _round_up(B, 128)                       # batch padded to lane width
    tile = min(_round_up(batch_tile, 128), lanes)
    n_tc = _num_tensorcores()
    if n_tc > 1 and lanes >= n_tc * 128:
        # v7x: make the grid length a multiple of the TC count so both cores
        # get balanced work under dimension_semantics=("parallel",).
        steps = _round_up(max(n_tc, pl.cdiv(lanes, tile)), n_tc)
        tile = _round_up(pl.cdiv(lanes, steps), 128)
    Bp = _round_up(B, tile)
    grid = Bp // tile

    # In-kernel lane-chunk size (multiple of 128, <= tile).
    chunk = max(128, (min(lane_chunk, tile) // 128) * 128)

    # Layout plumbing: pad + transpose (batch -> lanes) + bf16 cast.  This
    # runs under the same jit as the pallas_call, so XLA fuses it into a
    # single HBM pass over x instead of 2-3 round trips.
    x_t = jnp.pad(x, ((0, Bp - B), (0, 0))).T.astype(jnp.bfloat16)   # (L, Bp)

    # Weights/biases: full-array blocks with constant index_maps -> resident
    # in VMEM across grid steps; only the x tile and the output stream.
    def full(arr):
        return pl.BlockSpec(arr.shape, lambda i: (0, 0))

    out = pl.pallas_call(
        _make_decoder_kernel(tile, chunk),
        out_shape=jax.ShapeDtypeStruct((1, Bp), jnp.float32),
        grid_spec=pltpu.PrefetchScalarGridSpec(
            num_scalar_prefetch=0,
            grid=(grid,),
            in_specs=[
                pl.BlockSpec((L, tile), lambda i: (0, i)),   # x tile, batch on lanes
                full(w1), full(b1),
                full(w2), full(b2),
                full(w3), full(b3),
                full(w4), full(b4),
                full(w5), full(b5),
            ],
            out_specs=pl.BlockSpec((1, tile), lambda i: (0, i)),
        ),
        compiler_params=pltpu.CompilerParams(
            dimension_semantics=("parallel",)),   # batch tiles shard across TCs
    )(x_t, w1, b1, w2, b2, w3, b3, w4, b4, w5, b5)

    # Slice off batch padding; torch's .squeeze() removes singleton dims.
    return jnp.squeeze(out[0, :B])


_decoder_forward_jit = jax.jit(_decoder_forward_impl, static_argnums=(2, 3))


def decoder_forward(x, params, *, batch_tile=2048, lane_chunk=512):
    """x: (B, latent_dim) float32.
    params: 5 (W, b) pairs from make_decoder_params (PyTorch semantics)."""
    return _decoder_forward_jit(x, params, batch_tile, lane_chunk)


# ---------------- parameter setup (plain-JAX glue) ----------------

def _linear_init(key, fan_in, fan_out):
    """Mimics PyTorch Linear default init (uniform +/- 1/sqrt(fan_in)).
    Returns W in PyTorch layout (out, in) and bias (out,)."""
    kw, kb = jax.random.split(key)
    bound = 1.0 / jnp.sqrt(jnp.float32(fan_in))
    w = jax.random.uniform(kw, (fan_out, fan_in), jnp.float32, -bound, bound)
    b = jax.random.uniform(kb, (fan_out,), jnp.float32, -bound, bound)
    return w, b


def _spectral_normalize(w_out_in, key):
    """One power iteration with a deterministic unit-norm u, then W / sigma."""
    # TODO(synk): PyTorch's spectral_norm keeps a persistent power-iteration
    # `u` buffer that converges across forwards; this one-shot deterministic
    # iteration is parameter-setup glue, not a replica of that state.
    u = jax.random.normal(key, (w_out_in.shape[0],), jnp.float32)
    u = u / (jnp.linalg.norm(u) + 1e-12)
    v = w_out_in.T @ u
    v = v / (jnp.linalg.norm(v) + 1e-12)
    u = w_out_in @ v
    u = u / (jnp.linalg.norm(u) + 1e-12)
    sigma = u @ (w_out_in @ v)
    return w_out_in / sigma


def make_decoder_params(key, latent_dim, hidden_dim):
    keys = jax.random.split(key, 10)
    dims = [(latent_dim, hidden_dim),
            (hidden_dim, hidden_dim),
            (hidden_dim, hidden_dim),
            (hidden_dim, hidden_dim),
            (hidden_dim, 1)]
    params = []
    for idx, (fi, fo) in enumerate(dims):
        w_oi, b = _linear_init(keys[2 * idx], fi, fo)
        if idx < 4:  # first four linears carry spectral_norm
            w_oi = _spectral_normalize(w_oi, keys[2 * idx + 1])
            # MXU layers: (out, in) weight in bf16, (out, 1) bias in f32.
            params.append((jnp.asarray(w_oi, jnp.bfloat16),
                           jnp.asarray(b.reshape(fo, 1), jnp.float32)))
        else:
            # Final Linear(hidden, 1): stored as an f32 (hidden, 1) column so
            # the kernel runs it on the VPU/XLU (broadcast-mul + sublane
            # reduce) instead of a 1-output-row MXU matmul.
            params.append((jnp.asarray(w_oi.T, jnp.float32),
                           jnp.asarray(b.reshape(1, 1), jnp.float32)))
    return params


if __name__ == "__main__":
    latent_dim, hidden_dim, batch = 16, 32, 16

    key = jax.random.PRNGKey(0)
    k_params, k_x = jax.random.split(key)

    params = make_decoder_params(k_params, latent_dim, hidden_dim)
    x = jax.random.normal(k_x, (batch, latent_dim), jnp.float32)

    y = decoder_forward(x, params)
    jax.block_until_ready(y)

    # Pure-JAX reference with numerics matched to the kernel
    # (bf16 MXU operands, f32 accumulation/ELU, f32 VPU final layer).
    def ref(x, params):
        h = x.T.astype(jnp.bfloat16)                       # (L, B)
        for i in range(4):
            w, b = params[i]
            a = jnp.dot(w, h, preferred_element_type=jnp.float32) + b
            a = jnp.where(a > 0.0, a, jnp.exp(a) - 1.0)
            h = a.astype(jnp.bfloat16) if i < 3 else a
        w5, b5 = params[4]
        out = jnp.sum(w5 * h, axis=0, keepdims=True) + b5
        return jnp.squeeze(out[0])

    y_ref = ref(x, params)
    assert y.shape == (batch,), y.shape
    assert jnp.allclose(y, y_ref, atol=1e-2, rtol=1e-2), (y, y_ref)

    print("KERNEL_OK")
</pallas_src>

<mosaic_0001>
module attributes {stable_mosaic.version = 11 : i64} {
  func.func @kernel(%arg0: i32, %arg1: memref<16x128xbf16, #tpu.memory_space<vmem>>, %arg2: memref<32x16xbf16, #tpu.memory_space<vmem>>, %arg3: memref<32x1xf32, #tpu.memory_space<vmem>>, %arg4: memref<32x32xbf16, #tpu.memory_space<vmem>>, %arg5: memref<32x1xf32, #tpu.memory_space<vmem>>, %arg6: memref<32x32xbf16, #tpu.memory_space<vmem>>, %arg7: memref<32x1xf32, #tpu.memory_space<vmem>>, %arg8: memref<32x32xbf16, #tpu.memory_space<vmem>>, %arg9: memref<32x1xf32, #tpu.memory_space<vmem>>, %arg10: memref<32x1xf32, #tpu.memory_space<vmem>>, %arg11: memref<1x1xf32, #tpu.memory_space<vmem>>, %arg12: memref<1x128xf32, #tpu.memory_space<vmem>>) attributes {dimension_semantics = [#tpu.dimension_semantics<parallel>], iteration_bounds = array<i64: 1>, scalar_prefetch = 0 : i64, scratch_operands = 0 : i64, tpu.core_type = #tpu.core_type<tc>, window_params = [{transform_indices = @transform_0, window_bounds = array<i64: 16, 128>}, {pipeline_mode = #tpu.pipeline_mode<synchronous>, transform_indices = @transform_1, window_bounds = array<i64: 32, 16>}, {pipeline_mode = #tpu.pipeline_mode<synchronous>, transform_indices = @transform_2, window_bounds = array<i64: 32, 1>}, {pipeline_mode = #tpu.pipeline_mode<synchronous>, transform_indices = @transform_3, window_bounds = array<i64: 32, 32>}, {pipeline_mode = #tpu.pipeline_mode<synchronous>, transform_indices = @transform_4, window_bounds = array<i64: 32, 1>}, {pipeline_mode = #tpu.pipeline_mode<synchronous>, transform_indices = @transform_5, window_bounds = array<i64: 32, 32>}, {pipeline_mode = #tpu.pipeline_mode<synchronous>, transform_indices = @transform_6, window_bounds = array<i64: 32, 1>}, {pipeline_mode = #tpu.pipeline_mode<synchronous>, transform_indices = @transform_7, window_bounds = array<i64: 32, 32>}, {pipeline_mode = #tpu.pipeline_mode<synchronous>, transform_indices = @transform_8, window_bounds = array<i64: 32, 1>}, {pipeline_mode = #tpu.pipeline_mode<synchronous>, transform_indices = @transform_9, window_bounds = array<i64: 32, 1>}, {pipeline_mode = #tpu.pipeline_mode<synchronous>, transform_indices = @transform_10, window_bounds = array<i64: 1, 1>}, {transform_indices = @transform_11, window_bounds = array<i64: 1, 128>}]} {
    %c0 = arith.constant 0 : index
    %c0_0 = arith.constant 0 : index
    %0 = vector.load %arg1[%c0, %c0_0] : memref<16x128xbf16, #tpu.memory_space<vmem>>, vector<16x128xbf16>
    %c0_1 = arith.constant 0 : index
    %c0_2 = arith.constant 0 : index
    %1 = vector.load %arg2[%c0_1, %c0_2] : memref<32x16xbf16, #tpu.memory_space<vmem>>, vector<32x16xbf16>
    %cst = arith.constant dense<0.000000e+00> : vector<32x128xf32>
    %2 = tpu.matmul %1, %0, %cst {dimension_numbers = #tpu.dot_dimension_numbers<[1], [0], [0], [1], [0, 0, 1, 1], [], []>} : vector<32x16xbf16>, vector<16x128xbf16>, vector<32x128xf32> -> vector<32x128xf32>
    %c0_3 = arith.constant 0 : index
    %c0_4 = arith.constant 0 : index
    %3 = vector.load %arg3[%c0_3, %c0_4] : memref<32x1xf32, #tpu.memory_space<vmem>>, vector<32x1xf32>
    %4 = vector.broadcast %3 : vector<32x1xf32> to vector<32x128xf32>
    %5 = arith.addf %2, %4 : vector<32x128xf32>
    %cst_5 = arith.constant 0.000000e+00 : f32
    %6 = vector.broadcast %cst_5 : f32 to vector<32x128xf32>
    %7 = arith.cmpf ogt, %5, %6 : vector<32x128xf32>
    %8 = math.exp %5 : vector<32x128xf32>
    %cst_6 = arith.constant 1.000000e+00 : f32
    %9 = vector.broadcast %cst_6 : f32 to vector<32x128xf32>
    %10 = arith.subf %8, %9 : vector<32x128xf32>
    %11 = arith.select %7, %5, %10 : vector<32x128xi1>, vector<32x128xf32>
    %12 = arith.truncf %11 : vector<32x128xf32> to vector<32x128xbf16>
    %c0_7 = arith.constant 0 : index
    %c0_8 = arith.constant 0 : index
    %13 = vector.load %arg4[%c0_7, %c0_8] : memref<32x32xbf16, #tpu.memory_space<vmem>>, vector<32x32xbf16>
    %cst_9 = arith.constant dense<0.000000e+00> : vector<32x128xf32>
    %14 = tpu.matmul %13, %12, %cst_9 {dimension_numbers = #tpu.dot_dimension_numbers<[1], [0], [0], [1], [0, 0, 1, 1], [], []>} : vector<32x32xbf16>, vector<32x128xbf16>, vector<32x128xf32> -> vector<32x128xf32>
    %c0_10 = arith.constant 0 : index
    %c0_11 = arith.constant 0 : index
    %15 = vector.load %arg5[%c0_10, %c0_11] : memref<32x1xf32, #tpu.memory_space<vmem>>, vector<32x1xf32>
    %16 = vector.broadcast %15 : vector<32x1xf32> to vector<32x128xf32>
    %17 = arith.addf %14, %16 : vector<32x128xf32>
    %cst_12 = arith.constant 0.000000e+00 : f32
    %18 = vector.broadcast %cst_12 : f32 to vector<32x128xf32>
    %19 = arith.cmpf ogt, %17, %18 : vector<32x128xf32>
    %20 = math.exp %17 : vector<32x128xf32>
    %cst_13 = arith.constant 1.000000e+00 : f32
    %21 = vector.broadcast %cst_13 : f32 to vector<32x128xf32>
    %22 = arith.subf %20, %21 : vector<32x128xf32>
    %23 = arith.select %19, %17, %22 : vector<32x128xi1>, vector<32x128xf32>
    %24 = arith.truncf %23 : vector<32x128xf32> to vector<32x128xbf16>
    %c0_14 = arith.constant 0 : index
    %c0_15 = arith.constant 0 : index
    %25 = vector.load %arg6[%c0_14, %c0_15] : memref<32x32xbf16, #tpu.memory_space<vmem>>, vector<32x32xbf16>
    %cst_16 = arith.constant dense<0.000000e+00> : vector<32x128xf32>
    %26 = tpu.matmul %25, %24, %cst_16 {dimension_numbers = #tpu.dot_dimension_numbers<[1], [0], [0], [1], [0, 0, 1, 1], [], []>} : vector<32x32xbf16>, vector<32x128xbf16>, vector<32x128xf32> -> vector<32x128xf32>
    %c0_17 = arith.constant 0 : index
    %c0_18 = arith.constant 0 : index
    %27 = vector.load %arg7[%c0_17, %c0_18] : memref<32x1xf32, #tpu.memory_space<vmem>>, vector<32x1xf32>
    %28 = vector.broadcast %27 : vector<32x1xf32> to vector<32x128xf32>
    %29 = arith.addf %26, %28 : vector<32x128xf32>
    %cst_19 = arith.constant 0.000000e+00 : f32
    %30 = vector.broadcast %cst_19 : f32 to vector<32x128xf32>
    %31 = arith.cmpf ogt, %29, %30 : vector<32x128xf32>
    %32 = math.exp %29 : vector<32x128xf32>
    %cst_20 = arith.constant 1.000000e+00 : f32
    %33 = vector.broadcast %cst_20 : f32 to vector<32x128xf32>
    %34 = arith.subf %32, %33 : vector<32x128xf32>
    %35 = arith.select %31, %29, %34 : vector<32x128xi1>, vector<32x128xf32>
    %36 = arith.truncf %35 : vector<32x128xf32> to vector<32x128xbf16>
    %c0_21 = arith.constant 0 : index
    %c0_22 = arith.constant 0 : index
    %37 = vector.load %arg8[%c0_21, %c0_22] : memref<32x32xbf16, #tpu.memory_space<vmem>>, vector<32x32xbf16>
    %cst_23 = arith.constant dense<0.000000e+00> : vector<32x128xf32>
    %38 = tpu.matmul %37, %36, %cst_23 {dimension_numbers = #tpu.dot_dimension_numbers<[1], [0], [0], [1], [0, 0, 1, 1], [], []>} : vector<32x32xbf16>, vector<32x128xbf16>, vector<32x128xf32> -> vector<32x128xf32>
    %c0_24 = arith.constant 0 : index
    %c0_25 = arith.constant 0 : index
    %39 = vector.load %arg9[%c0_24, %c0_25] : memref<32x1xf32, #tpu.memory_space<vmem>>, vector<32x1xf32>
    %40 = vector.broadcast %39 : vector<32x1xf32> to vector<32x128xf32>
    %41 = arith.addf %38, %40 : vector<32x128xf32>
    %cst_26 = arith.constant 0.000000e+00 : f32
    %42 = vector.broadcast %cst_26 : f32 to vector<32x128xf32>
    %43 = arith.cmpf ogt, %41, %42 : vector<32x128xf32>
    %44 = math.exp %41 : vector<32x128xf32>
    %cst_27 = arith.constant 1.000000e+00 : f32
    %45 = vector.broadcast %cst_27 : f32 to vector<32x128xf32>
    %46 = arith.subf %44, %45 : vector<32x128xf32>
    %47 = arith.select %43, %41, %46 : vector<32x128xi1>, vector<32x128xf32>
    %c0_28 = arith.constant 0 : index
    %c0_29 = arith.constant 0 : index
    %48 = vector.load %arg10[%c0_28, %c0_29] : memref<32x1xf32, #tpu.memory_space<vmem>>, vector<32x1xf32>
    %49 = vector.broadcast %48 : vector<32x1xf32> to vector<32x128xf32>
    %50 = arith.mulf %49, %47 : vector<32x128xf32>
    %cst_30 = arith.constant dense<0.000000e+00> : vector<128xf32>
    %51 = vector.multi_reduction <add>, %50, %cst_30 [0] : vector<32x128xf32> to vector<128xf32>
    %52 = vector.shape_cast %51 : vector<128xf32> to vector<1x128xf32>
    %c0_31 = arith.constant 0 : index
    %c0_32 = arith.constant 0 : index
    %53 = vector.load %arg11[%c0_31, %c0_32] : memref<1x1xf32, #tpu.memory_space<vmem>>, vector<1x1xf32>
    %54 = vector.broadcast %53 : vector<1x1xf32> to vector<1x128xf32>
    %55 = arith.addf %52, %54 : vector<1x128xf32>
    %c0_33 = arith.constant 0 : index
    %c0_34 = arith.constant 0 : index
    %56 = vector.load %arg12[%c0_33, %c0_34] : memref<1x128xf32, #tpu.memory_space<vmem>>, vector<1x128xf32>
    tpu.vector_store %arg12[%c0_33, %c0_34], %55 {strides = array<i32>} : memref<1x128xf32, #tpu.memory_space<vmem>>, vector<1x128xf32>,
    return
  }
  func.func @transform_0(%arg0: i32) -> (i32, i32) {
    %c0_i32 = arith.constant 0 : i32
    %c0_i32_0 = arith.constant 0 : i32
    return %c0_i32, %arg0 : i32, i32
  }
  func.func @transform_1(%arg0: i32) -> (i32, i32) {
    %c0_i32 = arith.constant 0 : i32
    %c0_i32_0 = arith.constant 0 : i32
    %c0_i32_1 = arith.constant 0 : i32
    return %c0_i32, %c0_i32_0 : i32, i32
  }
  func.func @transform_2(%arg0: i32) -> (i32, i32) {
    %c0_i32 = arith.constant 0 : i32
    %c0_i32_0 = arith.constant 0 : i32
    %c0_i32_1 = arith.constant 0 : i32
    return %c0_i32, %c0_i32_0 : i32, i32
  }
  func.func @transform_3(%arg0: i32) -> (i32, i32) {
    %c0_i32 = arith.constant 0 : i32
    %c0_i32_0 = arith.constant 0 : i32
    %c0_i32_1 = arith.constant 0 : i32
    return %c0_i32, %c0_i32_0 : i32, i32
  }
  func.func @transform_4(%arg0: i32) -> (i32, i32) {
    %c0_i32 = arith.constant 0 : i32
    %c0_i32_0 = arith.constant 0 : i32
    %c0_i32_1 = arith.constant 0 : i32
    return %c0_i32, %c0_i32_0 : i32, i32
  }
  func.func @transform_5(%arg0: i32) -> (i32, i32) {
    %c0_i32 = arith.constant 0 : i32
    %c0_i32_0 = arith.constant 0 : i32
    %c0_i32_1 = arith.constant 0 : i32
    return %c0_i32, %c0_i32_0 : i32, i32
  }
  func.func @transform_6(%arg0: i32) -> (i32, i32) {
    %c0_i32 = arith.constant 0 : i32
    %c0_i32_0 = arith.constant 0 : i32
    %c0_i32_1 = arith.constant 0 : i32
    return %c0_i32, %c0_i32_0 : i32, i32
  }
  func.func @transform_7(%arg0: i32) -> (i32, i32) {
    %c0_i32 = arith.constant 0 : i32
    %c0_i32_0 = arith.constant 0 : i32
    %c0_i32_1 = arith.constant 0 : i32
    return %c0_i32, %c0_i32_0 : i32, i32
  }
  func.func @transform_8(%arg0: i32) -> (i32, i32) {
    %c0_i32 = arith.constant 0 : i32
    %c0_i32_0 = arith.constant 0 : i32
    %c0_i32_1 = arith.constant 0 : i32
    return %c0_i32, %c0_i32_0 : i32, i32
  }
  func.func @transform_9(%arg0: i32) -> (i32, i32) {
    %c0_i32 = arith.constant 0 : i32
    %c0_i32_0 = arith.constant 0 : i32
    %c0_i32_1 = arith.constant 0 : i32
    return %c0_i32, %c0_i32_0 : i32, i32
  }
  func.func @transform_10(%arg0: i32) -> (i32, i32) {
    %c0_i32 = arith.constant 0 : i32
    %c0_i32_0 = arith.constant 0 : i32
    %c0_i32_1 = arith.constant 0 : i32
    return %c0_i32, %c0_i32_0 : i32, i32
  }
  func.func @transform_11(%arg0: i32) -> (i32, i32) {
    %c0_i32 = arith.constant 0 : i32
    %c0_i32_0 = arith.constant 0 : i32
    return %c0_i32, %arg0 : i32, i32
  }
}

</mosaic_0001>

<bundles_post_ra>
// kernel: _decoder_forward_impl.1
= control target key start
LH: loop header
LB: loop body
LE: loop exit
PB: predicated region body
PF: predicated region fallthrough
CT: control target
= control target key end

     0   :  { %v544_v0 = vmov 0   ;;  %vm87_vm0 = vcmask 130048   ;;  %vm173_vm5 = vcmask 261120   ;;  %s704_s2 = inlined_call_operand.vmem [shape: f32[32,1], index: 2, kind: input, shape index: {}]   ;;  %s705_s0 = inlined_call_operand.vmem [shape: bf16[16,128], index: 0, kind: input, shape index: {}]   ;;  %s706_s1 = inlined_call_operand.vmem [shape: bf16[32,16], index: 1, kind: input, shape index: {}]   ;;  %s707_s4 = inlined_call_operand.vmem [shape: f32[32,1], index: 4, kind: input, shape index: {}]   ;;  %s708_s6 = inlined_call_operand.vmem [shape: f32[32,1], index: 6, kind: input, shape index: {}]   ;;  %s709_s8 = inlined_call_operand.vmem [shape: f32[32,1], index: 8, kind: input, shape index: {}]   ;;  %s710_s9 = inlined_call_operand.vmem [shape: f32[32,1], index: 9, kind: input, shape index: {}]   ;;  %s711_s10 = inlined_call_operand.<no memory space> [shape: f32[1,1], index: 10, kind: input, shape index: {}]   ;;  %s712_s3 = inlined_call_operand.vmem [shape: bf16[32,32], index: 3, kind: input, shape index: {}]   ;;  %s713_s5 = inlined_call_operand.vmem [shape: bf16[32,32], index: 5, kind: input, shape index: {}]   ;;  %s714_s7 = inlined_call_operand.vmem [shape: bf16[32,32], index: 7, kind: input, shape index: {}]   ;;  %s715_s11 = inlined_call_operand.vmem [shape: f32[1,128], index: 11, kind: output, shape index: {}]  }
   0x1   :  { %510 = vset.pattern.permute.xlu1 %v544_v0  ;;  %509 = vset.pattern.permute.xlu0 %v544_v0  ;;  %v49_v1 = vld [vmem:[%s704_s2 + $0x10] sm:$0xff]  ;;  %v47_v2 = vld [vmem:[%s704_s2] sm:$0xff]  ;;  %v50_v5 = vld [vmem:[%s704_s2 + $0x18] sm:$0xff]  ;;  %v16_v38 = vstv %s711_s10 }
   0x2   :  { %v499_v3 = vld [vmem:[%s705_s0] sm:$0xff]  ;;  %63 = vperm.xlu0 %509, %v49_v1   ;;  %53 = vperm.xlu1 %510, %v47_v2   ;;  %v48_v6 = vld [vmem:[%s704_s2 + $0x8] sm:$0xff]  ;;  %v228_v10 = vld [vmem:[%s708_s6 + $0x18] sm:$0xff]  ;;  %17 = vst [vmem:[#allocation2] sm:$0x1] %v16_v38 }
   0x3   :  { %v500_v4 = vld [vmem:[%s706_s1] sm:$0xff]  ;;  %101 = vmatpush.bf16.msra.mxu0 %v499_v3  ;;  %511 = vset.pattern.permute.xlu2 %v544_v0  ;;  %v140_v8 = vld [vmem:[%s707_s4 + $0x8] sm:$0xff]  ;;  %v313_v14 = vld [vmem:[%s709_s8 + $0x18] sm:$0xff] }
   0x4   :  { %v139_v7 = vld [vmem:[%s707_s4] sm:$0xff]  ;;  %v501_v9 = vld [vmem:[%s706_s1 + $0x8] sm:$0xff]  ;;  %v391_v16 = vld [vmem:[%s710_s9 + $0x10] sm:$0xff] }
   0x5   :  { %v225_v11 = vld [vmem:[%s708_s6] sm:$0xff]  ;;  %v311_v13 = vld [vmem:[%s709_s8 + $0x8] sm:$0xff]  ;;  %v392_v17 = vld [vmem:[%s710_s9 + $0x18] sm:$0xff] }
   0x6   :  { %451 = vmatmul.msk.bf16.vlgmr.msra.gmra.mxu0 %vm87_vm0, %v500_v4  ;;  %v310_v12 = vld [vmem:[%s709_s8] sm:$0xff]  ;;  %v141_v23 = vld [vmem:[%s707_s4 + $0x10] sm:$0xff]  ;;  %v142_v29 = vld [vmem:[%s707_s4 + $0x18] sm:$0xff] }
   0x7   :  { %v389_v15 = vld [vmem:[%s710_s9] sm:$0xff]  ;;  %155 = vperm.xlu2 %511, %v141_v23   ;;  %v227_v37 = vld [vmem:[%s708_s6 + $0x10] sm:$0xff]  ;;  %v226_v48 = vld [vmem:[%s708_s6 + $0x8] sm:$0xff] }
   0x8   :  { %v502_v53 = vld [vmem:[%s712_s3] sm:$0xff]  ;;  %v312_v54 = vld [vmem:[%s709_s8 + $0x10] sm:$0xff]  ;;  %v390_v55 = vld [vmem:[%s710_s9 + $0x8] sm:$0xff] }
   0x9   :  { %v503_v56 = vld [vmem:[%s712_s3 + $0x8] sm:$0xff]  ;;  %v426_v57 = vld [vmem:[#allocation2] sm:$0x1] }
   0xa   :  { %68 = vperm.xlu0 %509, %v50_v5   ;;  %58 = vperm.xlu1 %510, %v48_v6  }
   0xf   :  { %160 = vperm.xlu2 %511, %v142_v29  }
  0x12   :  { %145 = vperm.xlu0 %509, %v139_v7   ;;  %150 = vperm.xlu1 %510, %v140_v8  }
  0x16   :  { %452 = vmatmul.msk.bf16.gmra.mxu0 %vm87_vm0, %v501_v9 }
  0x17   :  { %241 = vperm.xlu2 %511, %v227_v37  }
  0x1a   :  { %246 = vperm.xlu0 %509, %v228_v10   ;;  %231 = vperm.xlu1 %510, %v225_v11  }
  0x1f   :  { %236 = vperm.xlu2 %511, %v226_v48  }
  0x22   :  { %316 = vperm.xlu0 %509, %v310_v12   ;;  %321 = vperm.xlu1 %510, %v311_v13  }
  0x27   :  { %326 = vperm.xlu2 %511, %v312_v54  }
  0x2a   :  { %331 = vperm.xlu0 %509, %v313_v14   ;;  %395 = vperm.xlu1 %510, %v389_v15  }
  0x2f   :  { %400 = vperm.xlu2 %511, %v390_v55  }
  0x32   :  { %405 = vperm.xlu0 %509, %v391_v16   ;;  %410 = vperm.xlu1 %510, %v392_v17  }
  0x37   :  { %429 = vperm.xlu2 %511, %v426_v57   ;;  %v507_v57 = vld [vmem:[%s714_s7 + $0x8] sm:$0xff] }
  0x61   :  { %v156_v60 = vpop.permute.xlu2 %155 }
  0x69   :  { %v161_v5 = vpop.permute.xlu2 %160 }
  0x74   :  { %v54_v19 = vpop.permute.xlu1 %53  ;;  %v64_v21 = vpop.permute.xlu0 %63 }
  0x7c   :  { %v59_v25 = vpop.permute.xlu1 %58  ;;  %v69_v31 = vpop.permute.xlu0 %68 }
  0x83   :  { %v103_v18 = vpop.f32.mrf.mxu0 }
  0x84   :  { %v104_v27 = vadd.f32 %v103_v18, %v54_v19  ;;  %v151_v63 = vpop.permute.xlu1 %150  ;;  %v146_v0 = vpop.permute.xlu0 %145 }
  0x86   :  { %v117_v32 = vmul.f32 1.442695, %v104_v27  ;;  %vm113_vm4 = vcmp.gt.f32.partialorder %v104_v27, 0.0 }
  0x8b   :  { %v105_v20 = vpop.f32.mrf.mxu0 }
  0x8c   :  { %v106_v26 = vadd.f32 %v105_v20, %v59_v25  ;;  %v505_v25 = vld [vmem:[%s713_s5 + $0x8] sm:$0xff]  ;;  %v247_v37 = vpop.permute.xlu0 %246 }
  0x8e   :  { %v119_v30 = vmul.f32 1.442695, %v106_v26  ;;  %vm114_vm3 = vcmp.gt.f32.partialorder %v106_v26, 0.0 }
  0x93   :  { %v108_v22 = vpop.f32.mrf.mxu0 }
  0x94   :  { %v109_v24 = vadd.f32 %v108_v22, %v64_v21 }
  0x96   :  { %v121_v28 = vmul.f32 1.442695, %v109_v24  ;;  %vm115_vm1 = vcmp.gt.f32.partialorder %v109_v24, 0.0 }
  0x98   :  { %512 = vpow2.f32 %v121_v28 }
  0x99   :  { %514 = vpow2.f32 %v119_v30 }
  0x9a   :  { %516 = vpow2.f32 %v117_v32  ;;  %v232_v32 = vpop.permute.xlu1 %231 }
  0x9b   :  { %v110_v33 = vpop.f32.mrf.mxu0 }
  0x9c   :  { %v111_v34 = vadd.f32 %v110_v33, %v69_v31 }
  0x9e   :  { %v123_v35 = vmul.f32 1.442695, %v111_v34  ;;  %v513_v36 = vpop.eup %512  ;;  %vm116_vm2 = vcmp.gt.f32.partialorder %v111_v34, 0.0 }
  0x9f   :  { %v515_v39 = vpop.eup %514  ;;  %v455_v41 = vadd.f32 -1.0, %v513_v36 }
  0xa0   :  { %518 = vpow2.f32 %v123_v35  ;;  %v517_v40 = vpop.eup %516  ;;  %v454_v44 = vadd.f32 -1.0, %v515_v39 }
  0xa1   :  { %v131_v45 = vsel %vm115_vm1, %v109_v24, %v455_v41  ;;  %v453_v47 = vadd.f32 -1.0, %v517_v40  ;;  %v504_v24 = vld [vmem:[%s713_s5] sm:$0xff] }
  0xa2   :  { %v130_v50 = vsel %vm114_vm3, %v106_v26, %v454_v44 }
  0xa3   :  { %v129_v51 = vsel %vm113_vm4, %v104_v27, %v453_v47  ;;  %v242_v27 = vpop.permute.xlu2 %241 }
  0xa4   :  { %v133_v52 = vpack.c.bf16 %v130_v50, %v129_v51 }
  0xa6   :  { %v519_v42 = vpop.eup %518 }
  0xa7   :  { %v456_v43 = vadd.f32 -1.0, %v519_v42 }
  0xa9   :  { %v132_v46 = vsel %vm116_vm2, %v111_v34, %v456_v43 }
  0xaa   :  { %v134_v49 = vpack.c.bf16 %v132_v46, %v131_v45 }
  0xab   :  { %v237_v31 = vpop.permute.xlu2 %236 }
  0xac   :  { %186 = vmatpush.bf16.msra.mxu1 %v134_v49 }
  0xb0   :  { %187 = vmatpush.bf16.msra.mxu1 %v133_v52 }
  0xb3   :  { %465 = vmatmul.msk.bf16.vlgmr.msra.gmra.mxu1 %vm173_vm5, %v502_v53 }
  0xc3   :  { %466 = vmatmul.msk.bf16.gmra.mxu1 %vm173_vm5, %v503_v56  ;;  %v506_v56 = vld [vmem:[%s714_s7] sm:$0xff] }
 0x130   :  { %v189_v58 = vpop.f32.mrf.mxu1 }
 0x131   :  { %v190_v2 = vadd.f32 %v189_v58, %v146_v0 }
 0x133   :  { %v203_v6 = vmul.f32 1.442695, %v190_v2  ;;  %vm199_vm9 = vcmp.gt.f32.partialorder %v190_v2, 0.0 }
 0x138   :  { %v191_v59 = vpop.f32.mrf.mxu1 }
 0x139   :  { %v192_v1 = vadd.f32 %v191_v59, %v151_v63  ;;  %v322_v59 = vpop.permute.xlu1 %321 }
 0x13b   :  { %v205_v4 = vmul.f32 1.442695, %v192_v1  ;;  %vm200_vm8 = vcmp.gt.f32.partialorder %v192_v1, 0.0 }
 0x140   :  { %v194_v61 = vpop.f32.mrf.mxu1 }
 0x141   :  { %v195_v62 = vadd.f32 %v194_v61, %v156_v60 }
 0x143   :  { %v207_v3 = vmul.f32 1.442695, %v195_v62  ;;  %vm201_vm6 = vcmp.gt.f32.partialorder %v195_v62, 0.0 }
 0x145   :  { %520 = vpow2.f32 %v207_v3 }
 0x146   :  { %522 = vpow2.f32 %v205_v4 }
 0x147   :  { %524 = vpow2.f32 %v203_v6 }
 0x148   :  { %v196_v7 = vpop.f32.mrf.mxu1 }
 0x149   :  { %v197_v8 = vadd.f32 %v196_v7, %v161_v5 }
 0x14b   :  { %v209_v9 = vmul.f32 1.442695, %v197_v8  ;;  %v521_v10 = vpop.eup %520  ;;  %vm202_vm7 = vcmp.gt.f32.partialorder %v197_v8, 0.0 }
 0x14c   :  { %v523_v11 = vpop.eup %522  ;;  %v469_v13 = vadd.f32 -1.0, %v521_v10 }
 0x14d   :  { %526 = vpow2.f32 %v209_v9  ;;  %v525_v12 = vpop.eup %524  ;;  %v468_v16 = vadd.f32 -1.0, %v523_v11 }
 0x14e   :  { %v217_v17 = vsel %vm201_vm6, %v195_v62, %v469_v13  ;;  %v467_v19 = vadd.f32 -1.0, %v525_v12  ;;  %v317_v62 = vpop.permute.xlu0 %316 }
 0x14f   :  { %v216_v21 = vsel %vm200_vm8, %v192_v1, %v468_v16 }
 0x150   :  { %v215_v22 = vsel %vm199_vm9, %v190_v2, %v467_v19  ;;  %v327_v2 = vpop.permute.xlu2 %326 }
 0x151   :  { %v219_v23 = vpack.c.bf16 %v216_v21, %v215_v22 }
 0x153   :  { %v527_v14 = vpop.eup %526 }
 0x154   :  { %v470_v15 = vadd.f32 -1.0, %v527_v14  ;;  %v396_v14 = vpop.permute.xlu1 %395 }
 0x156   :  { %v218_v18 = vsel %vm202_vm7, %v197_v8, %v470_v15  ;;  %v332_v7 = vpop.permute.xlu0 %331 }
 0x157   :  { %v220_v20 = vpack.c.bf16 %v218_v18, %v217_v17 }
 0x158   :  { %v401_v18 = vpop.permute.xlu2 %400 }
 0x159   :  { %271 = vmatpush.bf16.msra.mxu2 %v220_v20 }
 0x15d   :  { %272 = vmatpush.bf16.msra.mxu2 %v219_v23 }
 0x15e   :  { %v406_v22 = vpop.permute.xlu0 %405 }
 0x160   :  { %479 = vmatmul.msk.bf16.vlgmr.msra.gmra.mxu2 %vm173_vm5, %v504_v24 }
 0x170   :  { %480 = vmatmul.msk.bf16.gmra.mxu2 %vm173_vm5, %v505_v25 }
 0x1e3   :  { %v274_v26 = vpop.f32.mrf.mxu2 }
 0x1e4   :  { %v275_v34 = vadd.f32 %v274_v26, %v232_v32 }
 0x1e6   :  { %v288_v38 = vmul.f32 1.442695, %v275_v34  ;;  %vm284_vm13 = vcmp.gt.f32.partialorder %v275_v34, 0.0 }
 0x1eb   :  { %v276_v28 = vpop.f32.mrf.mxu2 }
 0x1ec   :  { %v277_v33 = vadd.f32 %v276_v28, %v237_v31  ;;  %v411_v28 = vpop.permute.xlu1 %410 }
 0x1ee   :  { %v290_v36 = vmul.f32 1.442695, %v277_v33  ;;  %vm285_vm12 = vcmp.gt.f32.partialorder %v277_v33, 0.0 }
 0x1f3   :  { %v279_v29 = vpop.f32.mrf.mxu2 }
 0x1f4   :  { %v280_v30 = vadd.f32 %v279_v29, %v242_v27 }
 0x1f6   :  { %v292_v35 = vmul.f32 1.442695, %v280_v30  ;;  %vm286_vm10 = vcmp.gt.f32.partialorder %v280_v30, 0.0 }
 0x1f8   :  { %528 = vpow2.f32 %v292_v35 }
 0x1f9   :  { %530 = vpow2.f32 %v290_v36 }
 0x1fa   :  { %532 = vpow2.f32 %v288_v38 }
 0x1fb   :  { %v281_v39 = vpop.f32.mrf.mxu2 }
 0x1fc   :  { %v282_v40 = vadd.f32 %v281_v39, %v247_v37  ;;  %v430_v37 = vpop.permute.xlu2 %429 }
 0x1fd   :  { %v432_v39 = vperm.slane %v430_v37, 0 }
 0x1fe   :  { %v294_v41 = vmul.f32 1.442695, %v282_v40  ;;  %v529_v42 = vpop.eup %528  ;;  %vm287_vm11 = vcmp.gt.f32.partialorder %v282_v40, 0.0 }
 0x1ff   :  { %v531_v43 = vpop.eup %530  ;;  %v483_v45 = vadd.f32 -1.0, %v529_v42 }
 0x200   :  { %534 = vpow2.f32 %v294_v41  ;;  %v533_v44 = vpop.eup %532  ;;  %v482_v48 = vadd.f32 -1.0, %v531_v43 }
 0x201   :  { %v302_v49 = vsel %vm286_vm10, %v280_v30, %v483_v45  ;;  %v481_v51 = vadd.f32 -1.0, %v533_v44 }
 0x202   :  { %v301_v53 = vsel %vm285_vm12, %v277_v33, %v482_v48 }
 0x203   :  { %v300_v54 = vsel %vm284_vm13, %v275_v34, %v481_v51 }
 0x204   :  { %v304_v55 = vpack.c.bf16 %v301_v53, %v300_v54 }
 0x206   :  { %v535_v46 = vpop.eup %534 }
 0x207   :  { %v484_v47 = vadd.f32 -1.0, %v535_v46 }
 0x209   :  { %v303_v50 = vsel %vm287_vm11, %v282_v40, %v484_v47 }
 0x20a   :  { %v305_v52 = vpack.c.bf16 %v303_v50, %v302_v49 }
 0x20c   :  { %356 = vmatpush.bf16.msra.mxu3 %v305_v52 }
 0x210   :  { %357 = vmatpush.bf16.msra.mxu3 %v304_v55 }
 0x213   :  { %493 = vmatmul.msk.bf16.vlgmr.msra.gmra.mxu3 %vm173_vm5, %v506_v56 }
 0x223   :  { %494 = vmatmul.msk.bf16.gmra.mxu3 %vm173_vm5, %v507_v57 }
 0x296   :  { %v359_v58 = vpop.f32.mrf.mxu3 }
 0x297   :  { %v360_v63 = vadd.f32 %v359_v58, %v317_v62 }
 0x299   :  { %v373_v1 = vmul.f32 1.442695, %v360_v63  ;;  %vm369_vm15 = vcmp.gt.f32.partialorder %v360_v63, 0.0 }
 0x29e   :  { %v361_v60 = vpop.f32.mrf.mxu3 }
 0x29f   :  { %v362_v61 = vadd.f32 %v361_v60, %v322_v59 }
 0x2a1   :  { %v375_v0 = vmul.f32 1.442695, %v362_v61  ;;  %vm370_vm14 = vcmp.gt.f32.partialorder %v362_v61, 0.0 }
 0x2a3   :  { %536 = vpow2.f32 %v375_v0 }
 0x2a4   :  { %538 = vpow2.f32 %v373_v1 }
 0x2a6   :  { %v364_v3 = vpop.f32.mrf.mxu3 }
 0x2a7   :  { %v365_v4 = vadd.f32 %v364_v3, %v327_v2 }
 0x2a9   :  { %v377_v5 = vmul.f32 1.442695, %v365_v4  ;;  %v537_v6 = vpop.eup %536  ;;  %vm371_vm0 = vcmp.gt.f32.partialorder %v365_v4, 0.0 }
 0x2aa   :  { %v539_v9 = vpop.eup %538  ;;  %v496_v11 = vadd.f32 -1.0, %v537_v6 }
 0x2ab   :  { %540 = vpow2.f32 %v377_v5  ;;  %v495_v15 = vadd.f32 -1.0, %v539_v9 }
 0x2ac   :  { %v386_v17 = vsel %vm370_vm14, %v362_v61, %v496_v11 }
 0x2ad   :  { %v385_v19 = vsel %vm369_vm15, %v360_v63, %v495_v15  ;;  %v414_v21 = vmul.f32 %v401_v18, %v386_v17 }
 0x2ae   :  { %v366_v8 = vpop.f32.mrf.mxu3  ;;  %v413_v24 = vmul.f32 %v396_v14, %v385_v19 }
 0x2af   :  { %v367_v10 = vadd.f32 %v366_v8, %v332_v7 }
 0x2b0   :  { %v417_v27 = vadd.f32 %v414_v21, %v413_v24 }
 0x2b1   :  { %v541_v12 = vpop.eup %540  ;;  %v379_v13 = vmul.f32 1.442695, %v367_v10  ;;  %vm372_vm1 = vcmp.gt.f32.partialorder %v367_v10, 0.0 }
 0x2b2   :  { %v497_v16 = vadd.f32 -1.0, %v541_v12 }
 0x2b3   :  { %542 = vpow2.f32 %v379_v13 }
 0x2b4   :  { %v387_v20 = vsel %vm371_vm0, %v365_v4, %v497_v16 }
 0x2b5   :  { %v415_v25 = vmul.f32 %v406_v22, %v387_v20 }
 0x2b7   :  { %v418_v30 = vadd.f32 %v417_v27, %v415_v25 }
 0x2b9   :  { %v543_v23 = vpop.eup %542 }
 0x2ba   :  { %v498_v26 = vadd.f32 -1.0, %v543_v23 }
 0x2bc   :  { %v388_v29 = vsel %vm372_vm1, %v367_v10, %v498_v26 }
 0x2bd   :  { %v416_v31 = vmul.f32 %v411_v28, %v388_v29 }
 0x2bf   :  { %v419_v32 = vadd.f32 %v418_v30, %v416_v31 }
 0x2c1   :  { %v420_v33 = vrot.slane %v419_v32, 4 }
 0x2c3   :  { %v421_v34 = vadd.f32 %v420_v33, %v419_v32 }
 0x2c5   :  { %v422_v35 = vrot.slane %v421_v34, 2 }
 0x2c7   :  { %v423_v36 = vadd.f32 %v422_v35, %v421_v34 }
 0x2c9   :  { %v424_v38 = vrot.slane %v423_v36, 1 }
 0x2cb   :  { %v425_v40 = vadd.f32 %v424_v38, %v423_v36 }
 0x2cd   :  { %v433_v41 = vadd.f32 %v432_v39, %v425_v40 }
 0x2cf   :  { %434 = vst [vmem:[%s715_s11] sm:$0x1] %v433_v41 }

</bundles_post_ra>
